<compile_context>
chip_gen: v7x
topology: tpu7x:2x2x1
jax: 0.10.0
libtpu: 0.0.40
codegen_flags: <defaults>
</compile_context>

<pallas_src>
import math

import jax
import jax.numpy as jnp
from jax.experimental import pallas as pl
from jax.experimental.pallas import tpu as pltpu


_LANE = 128
_MAX_SPATIAL_TILE_CAP = 1024     # upper bound on a 128-aligned spatial tile
_MAX_FUSED_PLANES = 1024         # bound on how many leading planes fuse per block


def _cdiv(a: int, b: int) -> int:
    return -(-a // b)


def _round_up(a: int, b: int) -> int:
    return _cdiv(a, b) * b


def _transpose_last2_kernel(x_ref, o_ref):
    # x_ref tile: (n, th, tw)  ->  o_ref tile: (n, tw, th).
    # Pure last-two-axis swap -> single XLU tile transpose per vreg tile.
    o_ref[...] = jnp.swapaxes(x_ref[...], 1, 2)


def _hw_budget():
    """(per-step padded payload target bytes, scoped VMEM limit bytes)."""
    vmem_cap = 64 << 20  # conservative default (v7x-sized) if query fails
    try:
        info = pltpu.get_tpu_info()
        vmem_cap = int(getattr(info, "vmem_capacity_bytes", vmem_cap))
    except Exception:
        pass
    if vmem_cap <= (64 << 20):
        # v7x: 64 MiB physical VMEM, 3.2 TB/s HBM -> bigger steps, raised limit.
        target = 6 << 20
        vmem_limit = min(48 << 20, (vmem_cap * 3) // 4)
    else:
        # v5e / v6e: 128 MiB physical VMEM.
        target = 8 << 20
        vmem_limit = 64 << 20
    return target, vmem_limit


def _max_spatial_tile(target_bytes: int, itemsize: int) -> int:
    """Largest 128-aligned square tile with tile*tile*itemsize <= target."""
    t = int(math.isqrt(max(1, target_bytes // itemsize)))
    t = max(_LANE, (t // _LANE) * _LANE)
    return min(t, _MAX_SPATIAL_TILE_CAP)


def _transpose_last2(x3: jax.Array) -> jax.Array:
    """(N, H, W) -> (N, W, H); the transpose itself runs in a Pallas kernel."""
    N, H, W = x3.shape
    dtype = x3.dtype
    if x3.size == 0:
        return jnp.empty((N, W, H), dtype=dtype)

    itemsize = jnp.dtype(dtype).itemsize
    target_bytes, vmem_limit = _hw_budget()

    # --- Spatial tiling: full extent if it fits, else 128-aligned tiles. ---
    max_tile = _max_spatial_tile(target_bytes, itemsize)
    th = H if H <= max_tile else max_tile
    tw = W if W <= max_tile else max_tile

    # --- Fold leading planes into the block until the padded payload hits the
    #     per-generation target (this also fixes the skinny-by-huge case). ---
    sub = max(8, 32 // itemsize)  # sublane packing: 8 f32 / 16 bf16 / 32 i8
    in_bytes = _round_up(th, sub) * _round_up(tw, _LANE) * itemsize
    out_bytes = _round_up(tw, sub) * _round_up(th, _LANE) * itemsize
    blk_bytes = max(in_bytes, out_bytes)
    n_blk = max(1, min(N, _MAX_FUSED_PLANES, target_bytes // blk_bytes))

    # Guarantee >= 2 grid steps when possible so v7x's two TensorCores both
    # get work ("parallel" semantics can only shard grid steps).
    spatial_steps = _cdiv(H, th) * _cdiv(W, tw)
    if spatial_steps == 1 and N >= 2:
        n_blk = min(n_blk, _cdiv(N, 2))

    # Grid order (N-chunks, W-tiles, H-tiles): the innermost axis (h) walks the
    # minor-most block index of the OUTPUT, so consecutive steps stream
    # contiguous output stripes; the strided traversal stays on the read side.
    grid = (_cdiv(N, n_blk), _cdiv(W, tw), _cdiv(H, th))
    in_specs = [pl.BlockSpec((n_blk, th, tw), lambda i, w, h: (i, h, w))]
    out_specs = pl.BlockSpec((n_blk, tw, th), lambda i, w, h: (i, w, h))

    # TODO(synk): when the output minor dim (H) is < 128 lanes, stores are
    # masked/lane-sparse; a lane-packing relayout of multiple planes along the
    # lane axis would recover that, but is not implemented here.

    cost = pl.CostEstimate(
        flops=0, transcendentals=0, bytes_accessed=2 * x3.size * itemsize
    )

    return pl.pallas_call(
        _transpose_last2_kernel,
        out_shape=jax.ShapeDtypeStruct((N, W, H), dtype),
        grid=grid,
        in_specs=in_specs,
        out_specs=out_specs,
        compiler_params=pltpu.CompilerParams(
            dimension_semantics=("parallel", "parallel", "parallel"),
            vmem_limit_bytes=vmem_limit,
        ),
        cost_estimate=cost,
    )(x3)


def transpose_pallas(x: jax.Array, shape=(2, 3)) -> jax.Array:
    """Equivalent of `x.transpose(*shape)` when the swapped axes are the last two."""
    d0, d1 = sorted(d % x.ndim for d in shape)
    if x.ndim < 2 or (d0, d1) != (x.ndim - 2, x.ndim - 1):
        # TODO(synk): only trailing-axis swaps are lowered to the Pallas kernel;
        # other axis pairs would need a different tiling strategy.
        raise NotImplementedError(
            "Pallas kernel implemented for swapping the last two axes only"
        )

    *lead, H, W = x.shape
    n = math.prod(lead) if lead else 1
    # Row-major reshapes of contiguous arrays are layout-preserving (free).
    y = _transpose_last2(x.reshape(n, H, W))
    return y.reshape(*lead, W, H)


class Transpose:
    """Mirror of the PyTorch wrapper class: stores the axis pair, applies it."""

    def __init__(self, shape: tuple):
        self.shape = shape

    def __call__(self, x: jax.Array) -> jax.Array:
        return transpose_pallas(x, self.shape)


if __name__ == "__main__":
    key = jax.random.PRNGKey(0)
    # Small NCHW input consistent with the module's typical usage.
    x = jax.random.normal(key, (2, 4, 16, 16), dtype=jnp.float32)

    mod = Transpose(shape=(2, 3))
    out = jax.block_until_ready(mod(x))

    ref = jnp.swapaxes(x, 2, 3)
    assert out.shape == ref.shape, (out.shape, ref.shape)
    assert out.dtype == ref.dtype, (out.dtype, ref.dtype)
    assert bool(jnp.array_equal(out, ref)), "mismatch vs reference transpose"

    print("KERNEL_OK")
</pallas_src>

<mosaic_0001>
module attributes {stable_mosaic.version = 11 : i64} {
  func.func @_transpose_last2_kernel(%arg0: i32, %arg1: i32, %arg2: i32, %arg3: memref<4x16x16xf32, #tpu.memory_space<vmem>>, %arg4: memref<4x16x16xf32, #tpu.memory_space<vmem>>) attributes {dimension_semantics = [#tpu.dimension_semantics<parallel>, #tpu.dimension_semantics<parallel>, #tpu.dimension_semantics<parallel>], iteration_bounds = array<i64: 2, 1, 1>, scalar_prefetch = 0 : i64, scratch_operands = 0 : i64, tpu.core_type = #tpu.core_type<tc>, window_params = [{transform_indices = @transform_0, window_bounds = array<i64: 4, 16, 16>}, {transform_indices = @transform_1, window_bounds = array<i64: 4, 16, 16>}]} {
    %c0 = arith.constant 0 : index
    %c0_0 = arith.constant 0 : index
    %c0_1 = arith.constant 0 : index
    %0 = vector.load %arg3[%c0, %c0_0, %c0_1] : memref<4x16x16xf32, #tpu.memory_space<vmem>>, vector<4x16x16xf32>
    %1 = tpu.transpose %0, [0, 2, 1] : vector<4x16x16xf32> -> vector<4x16x16xf32>
    %c0_2 = arith.constant 0 : index
    %c0_3 = arith.constant 0 : index
    %c0_4 = arith.constant 0 : index
    %2 = vector.load %arg4[%c0_2, %c0_3, %c0_4] : memref<4x16x16xf32, #tpu.memory_space<vmem>>, vector<4x16x16xf32>
    tpu.vector_store %arg4[%c0_2, %c0_3, %c0_4], %1 {strides = array<i32>} : memref<4x16x16xf32, #tpu.memory_space<vmem>>, vector<4x16x16xf32>,
    return
  }
  func.func @transform_0(%arg0: i32, %arg1: i32, %arg2: i32) -> (i32, i32, i32) {
    %c0_i32 = arith.constant 0 : i32
    return %arg0, %arg2, %arg1 : i32, i32, i32
  }
  func.func @transform_1(%arg0: i32, %arg1: i32, %arg2: i32) -> (i32, i32, i32) {
    %c0_i32 = arith.constant 0 : i32
    return %arg0, %arg1, %arg2 : i32, i32, i32
  }
}

</mosaic_0001>

<bundles_post_ra>
// kernel: tpu_custom_call.1
= control target key start
LH: loop header
LB: loop body
LE: loop exit
PB: predicated region body
PF: predicated region fallthrough
CT: control target
= control target key end

     0   :  { %6 = vsyncpa [#allocation3], 0  ;;  %s826_s0 = inlined_call_operand.hbm [shape: f32[8,16,16], index: 0, kind: input, shape index: {}]   ;;  %s827_s1 = inlined_call_operand.hbm [shape: f32[8,16,16], index: 1, kind: output, shape index: {}]  }
   0x1   :  { %8 = vsyncpa [#allocation3 + $0x1], 0 }
   0x2   :  { %9 = vsyncpa [#allocation4], 0 }
   0x3   :  { %11 = vsyncpa [#allocation4 + $0x1], 0  ;;  %s643_s6 = smov 0   ;;  %s645_s7 = smov 0  }
   0x4   :  { %s647_s8 = smov 0   ;;  %s649_s9 = smov 0  }
   0x5   :  { %s651_s10 = smov 0   ;;  %s653_s11 = smov 0  }
   0x6 LB: > { %s425_s12 = sadd.s32 4294967295, %s625_s11   ;;  %s426_s13 = sadd.s32 4294967294, %s625_s11   ;;  %s625_s11 = sphi %s653_s11, %s17_s11   ;;  %s621_s10 = sphi %s651_s10, %s842_s10   ;;  %s617_s9 = sphi %s649_s9, %s841_s9   ;;  %s613_s8 = sphi %s647_s8, %s840_s8   ;;  %s609_s7 = sphi %s645_s7, %s839_s7   ;;  %s605_s6 = sphi %s643_s6, %s838_s6  }
   0x7   : > { %s36_s14 = sadd.s32 1, %s621_s10  ;;  %s47_s15 = sadd.s32 1, %s613_s8 }
   0x8   : > { %p38_p0 = scmp.ge.s32.totalorder %s36_s14, 2  ;;  %p54_p1 = scmp.ne.s32.totalorder %s613_s8, %s609_s7 }
   0x9   : > { %p55_p2 = scmp.eq.s32.totalorder %s625_s11, 0  ;;  %p60_p3 = scmp.ne.s32.totalorder %s609_s7, %s605_s6 }
   0xa   : > { %s844_s14 = smov (%p38_p0, %s36_s14), 0  ;;  %p61_p5 = scmp.eq.s32.totalorder %s425_s12, 0 }
   0xb   : > { %p684_p4 = por %p55_p2, %p54_p1  ;;  %s40_s17 = ssub.s32 %s621_s10, %s844_s14 }
   0xc   : > { %p88_p6 = scmp.eq.s32.totalorder %s425_s12, 1  ;;  %p45_p7 = scmp.eq.s32.totalorder %s40_s17, 0 }
   0xd   : > { %p690_p8 = por %p61_p5, %p60_p3  ;;  %p94_p10 = scmp.eq.s32.totalorder %s426_s13, 1 }
   0xe   : > { %p694_p9 = por %p88_p6, %p54_p1  ;;  %p458_p13 = scmp.lt.s32.totalorder %s625_s11, 2 }
   0xf   : > { %s699_s20 = scalar_select %p45_p7, %s613_s8, %s47_s15  }
  0x10   : > { %s831_s19 = scalar_select %p694_p9, 1, 0 }
  0x11   : > { %p701_p11 = por %p94_p10, %p60_p3  ;;  %s114_s22 = sand.u32 1, %s613_s8  }
  0x12   : > { %s429_s23 = sshll.u32 %s114_s22, 6  ;;  %s443_s24 = sshll.u32 %s621_s10, 10 }
  0x13   : > { %s832_s21 = scalar_select %p701_p11, 1, 0 }
  0x14   : > { %s712_s27 = scalar_lea.hbm %s826_s0, %s443_s24  ;;  %s118_s28 = scalar_lea.vmem [#allocation2], %s429_s23 }
  0x15   : > { %s129_s29 = sshll.u32 %s118_s28, 4  ;;  %p718_p0 = pnand %p458_p13, %p684_p4  ;;  %s714_s29 = int_to_ptr.vmem [resolvable:$true] %s129_s29 }
  0x16   : > { %s723_s2 = scalar_lea.sflag [#allocation3], %s114_s22  ;;  %s513_s3 = scalar_lea.hbm %s712_s27, 1024 }
  0x17   : > { %p514_p2 = scmp.ne.s32.totalorder %s712_s27, %s513_s3  ;;  %p515_p3 = pneg %p718_p0 }
  0x18   : > { %s518_s12 = scalar_lea.hbm %s826_s0, 2048  ;;  %p519_p4 = scmp.lt.u32.totalorder %s712_s27, %s826_s0 }
  0x19   : > { %p516_p5 = pnand %p515_p3, %p514_p2  ;;  %p520_p7 = scmp.lt.u32.totalorder %s518_s12, %s513_s3 }
  0x1a   : > { %p522_p13 = scmp.lt.u32.totalorder %s513_s3, %s712_s27 }
  0x1b   : > { %p517_p6 = pneg %p516_p5  ;;  %p521_p10 = por %p520_p7, %p519_p4 }
  0x1d   : > { %p523_p12 = por %p522_p13, %p521_p10 }
  0x1f   : > { %p524_p1 = pnand %p523_p12, %p517_p6 }
  0x21   : > { %527 = shalt.err (!%p524_p1)
}
  0x22   : > { %s528_s16 = scalar_lea.vmem %s714_s29, 1024  ;;  %s627_s17 = smov [#allocation2]  }
  0x23   : > { %p529_p2 = scmp.ne.s32.totalorder %s714_s29, %s528_s16  ;;  %s533_s22 = sshll.u32 %s627_s17, 4  ;;  %s534_s22 = int_to_ptr.vmem [resolvable:$false] %s533_s22 }
  0x24   : > { %s535_s23 = scalar_lea.vmem %s534_s22, 2048  ;;  %p536_p9 = scmp.lt.s32.totalorder %s714_s29, %s534_s22 }
  0x25   : > { %p531_p5 = pnand %p529_p2, %p515_p3  ;;  %p537_p4 = scmp.lt.s32.totalorder %s535_s23, %s528_s16 }
  0x27   : > { %p532_p11 = pneg %p531_p5  ;;  %p538_p7 = por %p537_p4, %p536_p9 }
  0x29   : > { %p539_p10 = pnand %p538_p7, %p532_p11 }
  0x2b   : > { %542 = shalt.err (!%p539_p10)
}
  0x2c   : > { %s628_s24 = smov 128   ;;  %s629_s25 = smov 8  }
  0x2d   : > { %453 = dma.hbm_to_vmem [thread:$0]  (!%p718_p0), %s712_s27, 1024, %s714_s29, %s723_s2, %s628_s24, %s628_s24, %s629_s25  }
  0x2e   : > { %p137_p12 = scmp.lt.s32.totalorder %s625_s11, 3  ;;  %p834_p1 = scmp.ge.s32.totalorder %s625_s11, 1 }
  0x30   : > { %p138_p3 = pnand %p834_p1, %p137_p12 }
  0x31   : > { %s755_s26 = sand.u32 (!%p138_p3), 1, %s609_s7  }
  0x32   : > { %141 = sbr.rel (%p138_p3) target bundleno = 215 (0xd7), region = 24  ;;  %s434_s28 = sshll.u32 (!%p138_p3), %s755_s26, 6 }
  0x33   : > { %s144_s3 = scalar_lea.sflag (!%p138_p3), [#allocation3], %s755_s26  ;;  %s147_s4 = scalar_lea.vmem (!%p138_p3), [#allocation2], %s434_s28 }
  0x39   : > { %596 = dma.done.wait (%p690_p8), %s144_s3, 1024  }
  0x3a   : > { %598 = vsyncadd (%p690_p8), %s144_s3, 4294966272  ;;  %v172_v0 = vld [vmem:[%s147_s4 + $0x10] sm:$0xff]  ;;  %v170_v1 = vld [vmem:[%s147_s4] sm:$0xff]  ;;  %vm306_vm0 = vcmask 130048   ;;  %s165_s18 = scalar_lea.vmem [#allocation5], %s434_s28  ;;  %s445_s29 = sshll.u32 %s617_s9, 10 }
  0x3b   : > { %210 = vxpose.xlu1.b32.start [1/2] (short) (narrow) %v172_v0, 16  ;;  %178 = vxpose.xlu0.b32.start [1/2] (short) (narrow) %v170_v1, 16  ;;  %v173_v2 = vld [vmem:[%s147_s4 + $0x18] sm:$0xff]  ;;  %v171_v3 = vld [vmem:[%s147_s4 + $0x8] sm:$0xff]  ;;  %v176_v4 = vld [vmem:[%s147_s4 + $0x30] sm:$0xff]  ;;  %s333_s27 = sshll.u32 %s165_s18, 4  ;;  %s775_s5 = scalar_lea.hbm %s827_s1, %s445_s29  ;;  %s768_s27 = int_to_ptr.vmem [resolvable:$true] %s333_s27 }
  0x3c   : > { %v174_v5 = vld [vmem:[%s147_s4 + $0x20] sm:$0xff]  ;;  %v177_v6 = vld [vmem:[%s147_s4 + $0x38] sm:$0xff]  ;;  %v175_v7 = vld [vmem:[%s147_s4 + $0x28] sm:$0xff]  ;;  %s316_s9 = scalar_lea.sflag [#allocation4], %s755_s26  ;;  %s543_s12 = scalar_lea.vmem %s768_s27, 1024 }
  0x3d   : > { %p544_p8 = scmp.ne.s32.totalorder %s768_s27, %s543_s12  ;;  %p835_p9 = scmp.ne.s32.totalorder %s831_s19, 0 }
  0x3e   : > { %s630_s13 = smov [#allocation5]  }
  0x3f   : > { %211 = vxpose.xlu1.b32.end [2/2] (short) (narrow) %v173_v2, 16  ;;  %179 = vxpose.xlu0.b32.end [2/2] (short) (narrow) %v171_v3, 16  ;;  %p545_p11 = pnand %p544_p8, %p835_p9  ;;  %s547_s15 = sshll.u32 %s630_s13, 4  ;;  %s548_s15 = int_to_ptr.vmem [resolvable:$false] %s547_s15 }
  0x40   : > { %s549_s16 = scalar_lea.vmem %s548_s15, 2048  ;;  %p550_p6 = scmp.lt.s32.totalorder %s768_s27, %s548_s15 }
  0x41   : > { %p546_p0 = pneg %p545_p11  ;;  %p551_p13 = scmp.lt.s32.totalorder %s549_s16, %s543_s12 }
  0x43   : > { %274 = vxpose.xlu1.b32.start [1/2] (short) (narrow) %v176_v4, 16  ;;  %242 = vxpose.xlu0.b32.start [1/2] (short) (narrow) %v174_v5, 16  ;;  %p552_p2 = por %p551_p13, %p550_p6 }
  0x45   : > { %p553_p5 = pnand %p552_p2, %p546_p0 }
  0x47   : > { %275 = vxpose.xlu1.b32.end [2/2] (short) (narrow) %v177_v6, 16  ;;  %243 = vxpose.xlu0.b32.end [2/2] (short) (narrow) %v175_v7, 16 }
  0xbb   : > { %v226_v8 = vpop.trf.xlu1  ;;  %v194_v9 = vpop.trf.xlu0 }
  0xbc   : > { %309 = vst.msk [vmem:[%s165_s18 + $0x10] sm:$0xff] %vm306_vm0, %v226_v8  ;;  %307 = vst.msk [vmem:[%s165_s18] sm:$0xff] %vm306_vm0, %v194_v9 }
  0xbf   : > { %v227_v10 = vpop.trf.xlu1  ;;  %v195_v11 = vpop.trf.xlu0 }
  0xc0   : > { %310 = vst.msk [vmem:[%s165_s18 + $0x18] sm:$0xff] %vm306_vm0, %v227_v10  ;;  %308 = vst.msk [vmem:[%s165_s18 + $0x8] sm:$0xff] %vm306_vm0, %v195_v11 }
  0xc3   : > { %v290_v12 = vpop.trf.xlu1  ;;  %v258_v13 = vpop.trf.xlu0 }
  0xc4   : > { %313 = vst.msk [vmem:[%s165_s18 + $0x30] sm:$0xff] %vm306_vm0, %v290_v12  ;;  %311 = vst.msk [vmem:[%s165_s18 + $0x20] sm:$0xff] %vm306_vm0, %v258_v13 }
  0xc7   : > { %v291_v14 = vpop.trf.xlu1  ;;  %v259_v15 = vpop.trf.xlu0 }
  0xc8   : > { %314 = vst.msk [vmem:[%s165_s18 + $0x38] sm:$0xff] %vm306_vm0, %v291_v14  ;;  %312 = vst.msk [vmem:[%s165_s18 + $0x28] sm:$0xff] %vm306_vm0, %v259_v15 }
  0xc9   : > { %556 = shalt.err (!%p553_p5)
}
  0xca   : > { %s557_s17 = scalar_lea.hbm %s775_s5, 1024  ;;  %s561_s24 = scalar_lea.hbm %s827_s1, 2048 }
  0xcb   : > { %p558_p4 = scmp.ne.s32.totalorder %s775_s5, %s557_s17  ;;  %p562_p12 = scmp.lt.u32.totalorder %s775_s5, %s827_s1 }
  0xcc   : > { %p563_p1 = scmp.lt.u32.totalorder %s561_s24, %s557_s17  ;;  %p565_p8 = scmp.lt.u32.totalorder %s557_s17, %s775_s5 }
  0xcd   : > { %p559_p7 = pnand %p558_p4, %p835_p9 }
  0xce   : > { %p564_p3 = por %p563_p1, %p562_p12 }
  0xcf   : > { %p560_p10 = pneg %p559_p7 }
  0xd0   : > { %p566_p11 = por %p565_p8, %p564_p3 }
  0xd2   : > { %p567_p0 = pnand %p566_p11, %p560_p10 }
  0xd4   : > { %570 = shalt.err (!%p567_p0)
}
  0xd5   : > { %s631_s3 = smov 128   ;;  %s632_s4 = smov 8  }
  0xd6   : > { %448 = dma.vmem_to_hbm [thread:$0]  (%p835_p9), %s768_s27, 1024, %s775_s5, %s316_s9, %s631_s3, %s631_s3, %s632_s4  }
  0xd7 PF: > { %s348_s18 = sand.u32 1, %s605_s6   ;;  %p836_p6 = scmp.ne.s32.totalorder %s832_s21, 0 }
  0xd8   : > { %p837_p13 = scmp.ge.s32.totalorder %s625_s11, 2  ;;  %s349_s29 = scalar_lea.sflag [#allocation4], %s348_s18 }
  0xda   : > { %p455_p2 = pnand %p837_p13, %p836_p6 }
  0xdc   : > { %600 = dma.done.wait (!%p455_p2), %s349_s29, 1024  }
  0xdd   : > { %602 = vsyncadd (!%p455_p2), %s349_s29, 4294966272  ;;  %s17_s11 = sadd.s32 1, %s625_s11   ;;  %s838_s6 = smov %s609_s7 }
  0xde   : > { %p14_p5 = scmp.ge.s32.totalorder %s17_s11, 4   ;;  %s839_s7 = smov %s613_s8 }
  0xdf   : > { %s840_s8 = smov %s699_s20  ;;  %s841_s9 = smov %s621_s10 }
  0xe0   : > { %s842_s10 = smov %s844_s14  ;;  %16 = sbr.rel (!%p14_p5) target bundleno = 6 (0x6), region = 69 }
  0xe7   :  { %354 = vsyncpa [#allocation3], 1 }
  0xe8   :  { %356 = vsyncpa [#allocation3 + $0x1], 1 }
  0xe9   :  { %357 = vsyncpa [#allocation4], 1 }
  0xea   :  { %359 = vsyncpa [#allocation4 + $0x1], 1 }

</bundles_post_ra>
